<compile_context>
chip_gen: v7x
topology: tpu7x:2x2x1
jax: 0.10.0
libtpu: 0.0.40
codegen_flags: <defaults>
</compile_context>

<pallas_src>
import functools

import jax
import jax.numpy as jnp
from jax.experimental import pallas as pl
from jax.experimental.pallas import tpu as pltpu

LN_EPS = 1e-5


# ----------------------------------------------------------------------------
# Kernel bodies
# ----------------------------------------------------------------------------
def _layer_norm_gate(v, gamma, beta):
    """LayerNorm over the last axis, f32 math, fused statistics, clamped var."""
    v32 = v.astype(jnp.float32)
    g = v32.shape[-1]
    inv_g = 1.0 / g
    s1 = jnp.sum(v32, axis=-1, keepdims=True)
    s2 = jnp.sum(v32 * v32, axis=-1, keepdims=True)
    mean = s1 * inv_g
    var = jnp.maximum(s2 * inv_g - mean * mean, 0.0)   # guard against cancellation
    vn = (v32 - mean) * jax.lax.rsqrt(var + LN_EPS)
    return vn * gamma + beta                            # (1, G) broadcasts over (TB, S, G)


def sgu_split_kernel(u_ref, v_ref, w_ref, b_ref, gamma_ref, beta_ref, o_ref,
                     *scratch, seq_tiled):
    # u_ref:     (TB, ts, G)  gating half, only the rows this step writes
    # v_ref:     (TB, S,  G)  gate half, full sequence (needed by the LayerNorm)
    # w_ref:     (ts, S)      row tile of the proj weight, already in matmul dtype
    # b_ref:     (ts, 1)      per-output-row proj bias (f32)
    # gamma/beta (1, G)       LayerNorm affine (f32)
    # o_ref:     (TB, ts, G)
    # scratch:   [(TB, S, G) f32]  LayerNormed gate cache, only when seq_tiled
    tb = u_ref.shape[0]
    w = w_ref[...]
    bias = b_ref[...]

    if seq_tiled:
        vn_scr = scratch[0]

        # The LayerNormed gate only depends on the batch block, not the W row
        # tile: compute it once at m == 0 and reuse it for every row tile.
        @pl.when(pl.program_id(1) == 0)
        def _():
            vn_scr[...] = _layer_norm_gate(v_ref[...], gamma_ref[...], beta_ref[...])
    else:
        vn_val = _layer_norm_gate(v_ref[...], gamma_ref[...], beta_ref[...])

    for b in range(tb):
        vn_b = vn_scr[b] if seq_tiled else vn_val[b]          # (S, G) f32
        # bf16 (or f32) MXU operands, f32 accumulation; per-batch matmul fused
        # straight into the bias add + gating store (no (S, TB*G) temporary).
        vp = jnp.dot(w, vn_b.astype(w.dtype),
                     preferred_element_type=jnp.float32)      # (ts, G) f32
        o_ref[b] = (u_ref[b] * (vp + bias)).astype(o_ref.dtype)


def sgu_fused_kernel(x_ref, w_ref, b_ref, gamma_ref, beta_ref, o_ref, *,
                     fold_batch):
    # Fallback path when G % 128 != 0 (lane-aligned u/v BlockSpec split illegal).
    # x_ref: (TB, S, D); w_ref: (S, S) in matmul dtype; b_ref: (S, 1);
    # gamma/beta: (1, G); o_ref: (TB, S, G)
    tb, _, d = x_ref.shape
    g = d // 2
    w = w_ref[...]
    bias = b_ref[...]

    # Only the gate half is loaded up front; u is read lazily in the store loop
    # so it is not held live across the LayerNorm + matmul.
    vn = _layer_norm_gate(x_ref[:, :, g:], gamma_ref[...], beta_ref[...])

    if fold_batch:
        # Small G: fold the batch into the MXU N dimension (columns
        # [b*G:(b+1)*G] of the (S, TB*G) slab hold batch element b).
        # NOTE: for G < 128 a lane-dense padded output slab would additionally
        # avoid masked stores; kept simple here since this is the small-shape path.
        vn_cat = jnp.concatenate([vn[b] for b in range(tb)], axis=-1)
        vp_all = jnp.dot(w, vn_cat.astype(w.dtype),
                         preferred_element_type=jnp.float32)   # (S, TB*G) f32
        for b in range(tb):
            o_ref[b] = (x_ref[b, :, :g]
                        * (vp_all[:, b * g:(b + 1) * g] + bias)).astype(o_ref.dtype)
    else:
        for b in range(tb):
            vp = jnp.dot(w, vn[b].astype(w.dtype),
                         preferred_element_type=jnp.float32)   # (S, G) f32
            o_ref[b] = (x_ref[b, :, :g] * (vp + bias)).astype(o_ref.dtype)


# ----------------------------------------------------------------------------
# Tiling selection (per-generation VMEM budget aware)
# ----------------------------------------------------------------------------
def _divisors(n):
    return [d for d in range(1, n + 1) if n % d == 0]


def _vmem_capacity_bytes():
    """Physical VMEM per TensorCore; falls back to the smallest (v7x) figure."""
    try:
        cap = getattr(pltpu.get_tpu_info(), "vmem_capacity_bytes", None)
        if cap:
            return int(cap)
    except Exception:
        pass
    return 64 * 1024 * 1024


def _num_tensorcores():
    """TensorCores per chip (v7x: 2, v5e/v6e: 1)."""
    try:
        dev = jax.devices()[0]
        n = getattr(dev, "num_cores", None)
        if n:
            return int(n)
        return 2 if "v7" in str(getattr(dev, "device_kind", "")).lower() else 1
    except Exception:
        return 1


def _pick_batch_block(batch, est_fn, budget, cores, forced):
    if forced is not None:
        assert batch % forced == 0
        return forced
    fit = [t for t in _divisors(batch) if est_fn(t) <= budget] or [1]
    tb = fit[-1]
    if cores >= 2:
        # Keep >= `cores` steps on the parallel batch axis so every TensorCore
        # gets work (v7x).  Single-core chips (v5e/v6e) take the biggest tile.
        for t in reversed(fit):
            if batch // t >= cores:
                return t
    return tb


def _pick_split_tiling(B, S, G, x_item, w_item, budget, cores,
                       batch_block, seq_block):
    slack = 2 * 1024 * 1024                     # Mosaic-internal scratch headroom

    def est(tb, ts):
        tiled = ts < S
        n = 2 * tb * ts * G * x_item            # u blocks (double-buffered)
        n += 2 * tb * S * G * x_item            # v blocks (full S for the LN)
        n += 2 * tb * ts * G * x_item           # out blocks
        n += (2 if tiled else 1) * ts * S * w_item   # W (single-buffered if const)
        n += 2 * ts * 128 * 4                   # (ts, 1) bias pads lanes to 128
        n += 4 * 8 * max(G, 128) * 4            # gamma / beta
        n += tb * S * G * 4 if tiled else 0     # LayerNormed-gate VMEM scratch
        return n + slack

    if seq_block is not None:
        assert S % seq_block == 0
        ts_opts = [seq_block]
    else:
        ts_opts = [S] + [t for t in reversed(_divisors(S)) if t % 8 == 0 and t < S]

    for ts in ts_opts:
        tb = _pick_batch_block(B, lambda t: est(t, ts), budget, cores, batch_block)
        if est(tb, ts) <= budget:
            return tb, ts, est(tb, ts)
    # Nothing fits the estimate; take the smallest tiles and let vmem_limit
    # (clamped to the budget) decide.
    ts = ts_opts[-1]
    tb = batch_block if batch_block is not None else 1
    return tb, ts, est(tb, ts)


def _pick_fused_tiling(B, S, D, G, x_item, w_item, budget, cores, batch_block):
    slack = 2 * 1024 * 1024

    def est(tb):
        n = 2 * tb * S * D * x_item             # x blocks (double-buffered)
        n += 2 * tb * S * G * x_item            # out blocks
        n += S * S * w_item                     # W (single-buffered constant)
        n += 2 * S * 128 * 4 + 4 * 8 * max(G, 128) * 4
        return n + slack

    tb = _pick_batch_block(B, est, budget, cores, batch_block)
    return tb, est(tb)


# ----------------------------------------------------------------------------
# Wrapper
# ----------------------------------------------------------------------------
def spatial_gating_unit(x, proj_w, proj_b, ln_w, ln_b, *,
                        matmul_dtype=jnp.bfloat16,
                        batch_block=None, seq_block=None):
    """x: (B, S, D) -> (B, S, D // 2).

    matmul_dtype: MXU operand dtype for the spatial projection (bf16 default,
    f32 accumulation).  Pass jnp.float32 for strict f32 accuracy.
    """
    B, S, D = x.shape
    assert D % 2 == 0, "dim must be even"
    G = D // 2
    assert proj_w.shape == (S, S) and proj_b.shape == (S,)
    assert ln_w.shape == (G,) and ln_b.shape == (G,)

    # One-time wrapper-side casts / reshapes (never repeated per grid step).
    w_in = proj_w.astype(matmul_dtype)                  # (S, S)
    b_col = proj_b.reshape(S, 1).astype(jnp.float32)    # per-output-row bias
    gamma = ln_w.reshape(1, G).astype(jnp.float32)
    beta = ln_b.reshape(1, G).astype(jnp.float32)

    x_item = x.dtype.itemsize
    w_item = w_in.dtype.itemsize
    budget = int(0.85 * _vmem_capacity_bytes())         # per-generation budget
    cores = _num_tensorcores()

    split_uv = (G % 128 == 0)    # lane-aligned BlockSpec u/v split only when legal

    if split_uv:
        tb, ts, est = _pick_split_tiling(B, S, G, x_item, w_item, budget, cores,
                                         batch_block, seq_block)
        nb, nm = B // tb, S // ts
        seq_tiled = nm > 1
    else:
        tb, est = _pick_fused_tiling(B, S, D, G, x_item, w_item, budget, cores,
                                     batch_block)
        nb, nm, ts, seq_tiled = B // tb, 1, S, False

    vmem_limit = None
    if est > 16 * 1024 * 1024:
        vmem_limit = min(max(int(est * 1.4), 32 * 1024 * 1024), budget)

    out_shape = jax.ShapeDtypeStruct((B, S, G), x.dtype)

    def build(use_buffered):
        # pl.Buffered(1): constant-index operands do not need a second buffer.
        const = pl.Buffered(1) if use_buffered else None
        if split_uv:
            w_mode = None if seq_tiled else const       # W varies with m when tiled
            grid_spec = pltpu.PrefetchScalarGridSpec(
                num_scalar_prefetch=0,
                grid=(nb, nm),
                in_specs=[
                    # u: only the ts output rows this step gates.
                    pl.BlockSpec((tb, ts, G), lambda i, m: (i, m, 0)),
                    # v: full sequence, lane block index 1 (columns G:2G of x).
                    pl.BlockSpec((tb, S, G), lambda i, m: (i, 0, 1)),
                    pl.BlockSpec((ts, S), lambda i, m: (m, 0), pipeline_mode=w_mode),
                    pl.BlockSpec((ts, 1), lambda i, m: (m, 0), pipeline_mode=w_mode),
                    pl.BlockSpec((1, G), lambda i, m: (0, 0), pipeline_mode=const),
                    pl.BlockSpec((1, G), lambda i, m: (0, 0), pipeline_mode=const),
                ],
                out_specs=pl.BlockSpec((tb, ts, G), lambda i, m: (i, m, 0)),
                scratch_shapes=(
                    [pltpu.VMEM((tb, S, G), jnp.float32)] if seq_tiled else []),
            )
            # The row-tile axis stays "arbitrary": the scratch LayerNorm result
            # written at m == 0 is reused by later m steps.
            params = pltpu.CompilerParams(
                dimension_semantics=("parallel", "arbitrary"),
                vmem_limit_bytes=vmem_limit)
            kern = functools.partial(sgu_split_kernel, seq_tiled=seq_tiled)
            return pl.pallas_call(kern, out_shape=out_shape, grid_spec=grid_spec,
                                  compiler_params=params)(
                x, x, w_in, b_col, gamma, beta)
        else:
            grid_spec = pltpu.PrefetchScalarGridSpec(
                num_scalar_prefetch=0,
                grid=(nb,),
                in_specs=[
                    pl.BlockSpec((tb, S, D), lambda i: (i, 0, 0)),
                    pl.BlockSpec((S, S), lambda i: (0, 0), pipeline_mode=const),
                    pl.BlockSpec((S, 1), lambda i: (0, 0), pipeline_mode=const),
                    pl.BlockSpec((1, G), lambda i: (0, 0), pipeline_mode=const),
                    pl.BlockSpec((1, G), lambda i: (0, 0), pipeline_mode=const),
                ],
                out_specs=pl.BlockSpec((tb, S, G), lambda i: (i, 0, 0)),
            )
            params = pltpu.CompilerParams(
                dimension_semantics=("parallel",),
                vmem_limit_bytes=vmem_limit)
            kern = functools.partial(sgu_fused_kernel, fold_batch=(G < 128))
            return pl.pallas_call(kern, out_shape=out_shape, grid_spec=grid_spec,
                                  compiler_params=params)(
                x, w_in, b_col, gamma, beta)

    try:
        return build(use_buffered=True)
    except Exception:
        # BlockSpec(pipeline_mode=...) is a pure VMEM saving; if this jax build
        # rejects it, fall back to default double-buffering.
        return build(use_buffered=False)


# ----------------------------------------------------------------------------
# Pure-JAX reference mirroring the PyTorch forward (all f32, highest precision)
# ----------------------------------------------------------------------------
def sgu_reference(x, proj_w, proj_b, ln_w, ln_b):
    G = x.shape[-1] // 2
    u, v = x[..., :G], x[..., G:]
    mean = jnp.mean(v, axis=-1, keepdims=True)
    var = jnp.mean((v - mean) ** 2, axis=-1, keepdims=True)
    v = (v - mean) / jnp.sqrt(var + LN_EPS) * ln_w + ln_b
    vt = jnp.swapaxes(v, -1, -2)                           # (B, G, S)
    vt = jnp.einsum("bgs,ts->bgt", vt, proj_w,
                    precision=jax.lax.Precision.HIGHEST) + proj_b
    return u * jnp.swapaxes(vt, -1, -2)


# ----------------------------------------------------------------------------
# Self-test
# ----------------------------------------------------------------------------
if __name__ == "__main__":
    root = jax.random.PRNGKey(0)

    def make_inputs(idx, B, S, D, realistic):
        G = D // 2
        kx, kw, kb, kg, kq = jax.random.split(jax.random.fold_in(root, idx), 5)
        x = jax.random.normal(kx, (B, S, D), jnp.float32)
        if realistic:
            proj_w = 0.02 * jax.random.normal(kw, (S, S), jnp.float32)
            proj_b = jax.random.normal(kb, (S,), jnp.float32)
            ln_w = 1.0 + 0.1 * jax.random.normal(kg, (G,), jnp.float32)
            ln_b = 0.1 * jax.random.normal(kq, (G,), jnp.float32)
        else:
            # SpatialGatingUnit.init_weights(): proj.weight ~ N(0, 1e-6),
            # proj.bias = 1; LayerNorm affine stays at its default (1, 0).
            proj_w = 1e-6 * jax.random.normal(kw, (S, S), jnp.float32)
            proj_b = jnp.ones((S,), jnp.float32)
            ln_w = jnp.ones((G,), jnp.float32)
            ln_b = jnp.zeros((G,), jnp.float32)
        return x, proj_w, proj_b, ln_w, ln_b

    # (idx, B, S, D, realistic, matmul_dtype, tol, extra kwargs)
    cases = [
        (0, 4, 8, 32, False, jnp.bfloat16, 1e-5, {}),    # module init; fused + batch-fold path
        (1, 4, 8, 32, True, jnp.float32, 2e-3, {}),      # f32 check, fused path
        (2, 2, 128, 256, True, jnp.float32, 2e-3, {}),   # f32 check, split u/v path
        (3, 2, 128, 256, True, jnp.bfloat16, 5e-2, {}),  # bf16, split u/v path
        (4, 2, 128, 256, True, jnp.bfloat16, 5e-2, {"seq_block": 64}),  # row-tiled W + scratch
    ]

    for idx, B, S, D, realistic, mdt, tol, kw in cases:
        x, pw, pb, lw, lb = make_inputs(idx, B, S, D, realistic)
        out = spatial_gating_unit(x, pw, pb, lw, lb, matmul_dtype=mdt, **kw)
        out = jax.block_until_ready(out)
        ref = sgu_reference(x, pw, pb, lw, lb)
        assert out.shape == (B, S, D // 2)
        err = float(jnp.max(jnp.abs(out - ref)))
        assert jnp.allclose(out, ref, atol=tol, rtol=tol), (idx, err)

    print("KERNEL_OK")
</pallas_src>

<mosaic_0001>
module attributes {stable_mosaic.version = 11 : i64} {
  func.func @sgu_fused_kernel(%arg0: i32, %arg1: memref<4x8x32xf32, #tpu.memory_space<vmem>>, %arg2: memref<8x8xbf16, #tpu.memory_space<vmem>>, %arg3: memref<8x1xf32, #tpu.memory_space<vmem>>, %arg4: memref<1x16xf32, #tpu.memory_space<vmem>>, %arg5: memref<1x16xf32, #tpu.memory_space<vmem>>, %arg6: memref<4x8x16xf32, #tpu.memory_space<vmem>>) attributes {dimension_semantics = [#tpu.dimension_semantics<parallel>], iteration_bounds = array<i64: 1>, scalar_prefetch = 0 : i64, scratch_operands = 0 : i64, tpu.core_type = #tpu.core_type<tc>, window_params = [{transform_indices = @transform_0, window_bounds = array<i64: 4, 8, 32>}, {pipeline_mode = #tpu.pipeline_mode<synchronous>, transform_indices = @transform_1, window_bounds = array<i64: 8, 8>}, {pipeline_mode = #tpu.pipeline_mode<synchronous>, transform_indices = @transform_2, window_bounds = array<i64: 8, 1>}, {pipeline_mode = #tpu.pipeline_mode<synchronous>, transform_indices = @transform_3, window_bounds = array<i64: 1, 16>}, {pipeline_mode = #tpu.pipeline_mode<synchronous>, transform_indices = @transform_4, window_bounds = array<i64: 1, 16>}, {transform_indices = @transform_5, window_bounds = array<i64: 4, 8, 16>}]} {
    %c0 = arith.constant 0 : index
    %c0_0 = arith.constant 0 : index
    %0 = vector.load %arg2[%c0, %c0_0] : memref<8x8xbf16, #tpu.memory_space<vmem>>, vector<8x8xbf16>
    %c0_1 = arith.constant 0 : index
    %c0_2 = arith.constant 0 : index
    %1 = vector.load %arg3[%c0_1, %c0_2] : memref<8x1xf32, #tpu.memory_space<vmem>>, vector<8x1xf32>
    %c0_3 = arith.constant 0 : index
    %c0_4 = arith.constant 0 : index
    %c16 = arith.constant 16 : index
    %2 = vector.load %arg1[%c0_3, %c0_4, %c16] : memref<4x8x32xf32, #tpu.memory_space<vmem>>, vector<4x8x16xf32>
    %c0_5 = arith.constant 0 : index
    %c0_6 = arith.constant 0 : index
    %3 = vector.load %arg4[%c0_5, %c0_6] : memref<1x16xf32, #tpu.memory_space<vmem>>, vector<1x16xf32>
    %c0_7 = arith.constant 0 : index
    %c0_8 = arith.constant 0 : index
    %4 = vector.load %arg5[%c0_7, %c0_8] : memref<1x16xf32, #tpu.memory_space<vmem>>, vector<1x16xf32>
    %cst = arith.constant dense<0.000000e+00> : vector<4x8xf32>
    %5 = vector.multi_reduction <add>, %2, %cst [2] : vector<4x8x16xf32> to vector<4x8xf32>
    %6 = vector.shape_cast %5 : vector<4x8xf32> to vector<4x8x1xf32>
    %7 = arith.mulf %2, %2 : vector<4x8x16xf32>
    %cst_9 = arith.constant dense<0.000000e+00> : vector<4x8xf32>
    %8 = vector.multi_reduction <add>, %7, %cst_9 [2] : vector<4x8x16xf32> to vector<4x8xf32>
    %9 = vector.shape_cast %8 : vector<4x8xf32> to vector<4x8x1xf32>
    %cst_10 = arith.constant 6.250000e-02 : f32
    %10 = vector.broadcast %cst_10 : f32 to vector<4x8x1xf32>
    %11 = arith.mulf %6, %10 : vector<4x8x1xf32>
    %cst_11 = arith.constant 6.250000e-02 : f32
    %12 = vector.broadcast %cst_11 : f32 to vector<4x8x1xf32>
    %13 = arith.mulf %9, %12 : vector<4x8x1xf32>
    %14 = arith.mulf %11, %11 : vector<4x8x1xf32>
    %15 = arith.subf %13, %14 : vector<4x8x1xf32>
    %cst_12 = arith.constant 0.000000e+00 : f32
    %16 = vector.broadcast %cst_12 : f32 to vector<4x8x1xf32>
    %17 = arith.maximumf %15, %16 : vector<4x8x1xf32>
    %18 = vector.broadcast %11 : vector<4x8x1xf32> to vector<4x8x16xf32>
    %19 = arith.subf %2, %18 : vector<4x8x16xf32>
    %cst_13 = arith.constant 9.99999974E-6 : f32
    %20 = vector.broadcast %cst_13 : f32 to vector<4x8x1xf32>
    %21 = arith.addf %17, %20 : vector<4x8x1xf32>
    %22 = math.rsqrt %21 : vector<4x8x1xf32>
    %23 = vector.broadcast %22 : vector<4x8x1xf32> to vector<4x8x16xf32>
    %24 = arith.mulf %19, %23 : vector<4x8x16xf32>
    %25 = vector.shape_cast %3 : vector<1x16xf32> to vector<1x1x16xf32>
    %26 = vector.broadcast %25 : vector<1x1x16xf32> to vector<4x8x16xf32>
    %27 = arith.mulf %24, %26 : vector<4x8x16xf32>
    %28 = vector.shape_cast %4 : vector<1x16xf32> to vector<1x1x16xf32>
    %29 = vector.broadcast %28 : vector<1x1x16xf32> to vector<4x8x16xf32>
    %30 = arith.addf %27, %29 : vector<4x8x16xf32>
    %31 = vector.extract_strided_slice %30 {offsets = [0, 0, 0], sizes = [1, 8, 16], strides = [1, 1, 1]} : vector<4x8x16xf32> to vector<1x8x16xf32>
    %32 = vector.shape_cast %31 : vector<1x8x16xf32> to vector<8x16xf32>
    %33 = vector.extract_strided_slice %30 {offsets = [1, 0, 0], sizes = [1, 8, 16], strides = [1, 1, 1]} : vector<4x8x16xf32> to vector<1x8x16xf32>
    %34 = vector.shape_cast %33 : vector<1x8x16xf32> to vector<8x16xf32>
    %35 = vector.extract_strided_slice %30 {offsets = [2, 0, 0], sizes = [1, 8, 16], strides = [1, 1, 1]} : vector<4x8x16xf32> to vector<1x8x16xf32>
    %36 = vector.shape_cast %35 : vector<1x8x16xf32> to vector<8x16xf32>
    %37 = vector.extract_strided_slice %30 {offsets = [3, 0, 0], sizes = [1, 8, 16], strides = [1, 1, 1]} : vector<4x8x16xf32> to vector<1x8x16xf32>
    %38 = vector.shape_cast %37 : vector<1x8x16xf32> to vector<8x16xf32>
    %39 = tpu.concatenate %32, %34, %36, %38 in 1 : vector<8x16xf32>, vector<8x16xf32>, vector<8x16xf32>, vector<8x16xf32> -> vector<8x64xf32>
    %40 = arith.truncf %39 : vector<8x64xf32> to vector<8x64xbf16>
    %cst_14 = arith.constant dense<0.000000e+00> : vector<8x64xf32>
    %41 = tpu.matmul %0, %40, %cst_14 {dimension_numbers = #tpu.dot_dimension_numbers<[1], [0], [0], [1], [0, 0, 1, 1], [], []>} : vector<8x8xbf16>, vector<8x64xbf16>, vector<8x64xf32> -> vector<8x64xf32>
    %c0_15 = arith.constant 0 : index
    %c0_16 = arith.constant 0 : index
    %c0_17 = arith.constant 0 : index
    %42 = vector.load %arg1[%c0_15, %c0_16, %c0_17] : memref<4x8x32xf32, #tpu.memory_space<vmem>>, vector<1x8x16xf32>
    %43 = vector.shape_cast %42 : vector<1x8x16xf32> to vector<8x16xf32>
    %44 = vector.extract_strided_slice %41 {offsets = [0, 0], sizes = [8, 16], strides = [1, 1]} : vector<8x64xf32> to vector<8x16xf32>
    %45 = vector.broadcast %1 : vector<8x1xf32> to vector<8x16xf32>
    %46 = arith.addf %44, %45 : vector<8x16xf32>
    %47 = arith.mulf %43, %46 : vector<8x16xf32>
    %c0_18 = arith.constant 0 : index
    %c0_19 = arith.constant 0 : index
    %c0_20 = arith.constant 0 : index
    %48 = vector.load %arg6[%c0_18, %c0_19, %c0_20] : memref<4x8x16xf32, #tpu.memory_space<vmem>>, vector<1x8x16xf32>
    %49 = vector.shape_cast %48 : vector<1x8x16xf32> to vector<8x16xf32>
    %50 = vector.shape_cast %47 : vector<8x16xf32> to vector<1x8x16xf32>
    tpu.vector_store %arg6[%c0_18, %c0_19, %c0_20], %50 {strides = array<i32>} : memref<4x8x16xf32, #tpu.memory_space<vmem>>, vector<1x8x16xf32>,
    %c1 = arith.constant 1 : index
    %c0_21 = arith.constant 0 : index
    %c0_22 = arith.constant 0 : index
    %51 = vector.load %arg1[%c1, %c0_21, %c0_22] : memref<4x8x32xf32, #tpu.memory_space<vmem>>, vector<1x8x16xf32>
    %52 = vector.shape_cast %51 : vector<1x8x16xf32> to vector<8x16xf32>
    %53 = vector.extract_strided_slice %41 {offsets = [0, 16], sizes = [8, 16], strides = [1, 1]} : vector<8x64xf32> to vector<8x16xf32>
    %54 = vector.broadcast %1 : vector<8x1xf32> to vector<8x16xf32>
    %55 = arith.addf %53, %54 : vector<8x16xf32>
    %56 = arith.mulf %52, %55 : vector<8x16xf32>
    %c1_23 = arith.constant 1 : index
    %c0_24 = arith.constant 0 : index
    %c0_25 = arith.constant 0 : index
    %57 = vector.load %arg6[%c1_23, %c0_24, %c0_25] : memref<4x8x16xf32, #tpu.memory_space<vmem>>, vector<1x8x16xf32>
    %58 = vector.shape_cast %57 : vector<1x8x16xf32> to vector<8x16xf32>
    %59 = vector.shape_cast %56 : vector<8x16xf32> to vector<1x8x16xf32>
    tpu.vector_store %arg6[%c1_23, %c0_24, %c0_25], %59 {strides = array<i32>} : memref<4x8x16xf32, #tpu.memory_space<vmem>>, vector<1x8x16xf32>,
    %c2 = arith.constant 2 : index
    %c0_26 = arith.constant 0 : index
    %c0_27 = arith.constant 0 : index
    %60 = vector.load %arg1[%c2, %c0_26, %c0_27] : memref<4x8x32xf32, #tpu.memory_space<vmem>>, vector<1x8x16xf32>
    %61 = vector.shape_cast %60 : vector<1x8x16xf32> to vector<8x16xf32>
    %62 = vector.extract_strided_slice %41 {offsets = [0, 32], sizes = [8, 16], strides = [1, 1]} : vector<8x64xf32> to vector<8x16xf32>
    %63 = vector.broadcast %1 : vector<8x1xf32> to vector<8x16xf32>
    %64 = arith.addf %62, %63 : vector<8x16xf32>
    %65 = arith.mulf %61, %64 : vector<8x16xf32>
    %c2_28 = arith.constant 2 : index
    %c0_29 = arith.constant 0 : index
    %c0_30 = arith.constant 0 : index
    %66 = vector.load %arg6[%c2_28, %c0_29, %c0_30] : memref<4x8x16xf32, #tpu.memory_space<vmem>>, vector<1x8x16xf32>
    %67 = vector.shape_cast %66 : vector<1x8x16xf32> to vector<8x16xf32>
    %68 = vector.shape_cast %65 : vector<8x16xf32> to vector<1x8x16xf32>
    tpu.vector_store %arg6[%c2_28, %c0_29, %c0_30], %68 {strides = array<i32>} : memref<4x8x16xf32, #tpu.memory_space<vmem>>, vector<1x8x16xf32>,
    %c3 = arith.constant 3 : index
    %c0_31 = arith.constant 0 : index
    %c0_32 = arith.constant 0 : index
    %69 = vector.load %arg1[%c3, %c0_31, %c0_32] : memref<4x8x32xf32, #tpu.memory_space<vmem>>, vector<1x8x16xf32>
    %70 = vector.shape_cast %69 : vector<1x8x16xf32> to vector<8x16xf32>
    %71 = vector.extract_strided_slice %41 {offsets = [0, 48], sizes = [8, 16], strides = [1, 1]} : vector<8x64xf32> to vector<8x16xf32>
    %72 = vector.broadcast %1 : vector<8x1xf32> to vector<8x16xf32>
    %73 = arith.addf %71, %72 : vector<8x16xf32>
    %74 = arith.mulf %70, %73 : vector<8x16xf32>
    %c3_33 = arith.constant 3 : index
    %c0_34 = arith.constant 0 : index
    %c0_35 = arith.constant 0 : index
    %75 = vector.load %arg6[%c3_33, %c0_34, %c0_35] : memref<4x8x16xf32, #tpu.memory_space<vmem>>, vector<1x8x16xf32>
    %76 = vector.shape_cast %75 : vector<1x8x16xf32> to vector<8x16xf32>
    %77 = vector.shape_cast %74 : vector<8x16xf32> to vector<1x8x16xf32>
    tpu.vector_store %arg6[%c3_33, %c0_34, %c0_35], %77 {strides = array<i32>} : memref<4x8x16xf32, #tpu.memory_space<vmem>>, vector<1x8x16xf32>,
    return
  }
  func.func @transform_0(%arg0: i32) -> (i32, i32, i32) {
    %c0_i32 = arith.constant 0 : i32
    %c0_i32_0 = arith.constant 0 : i32
    %c0_i32_1 = arith.constant 0 : i32
    return %arg0, %c0_i32, %c0_i32_0 : i32, i32, i32
  }
  func.func @transform_1(%arg0: i32) -> (i32, i32) {
    %c0_i32 = arith.constant 0 : i32
    %c0_i32_0 = arith.constant 0 : i32
    %c0_i32_1 = arith.constant 0 : i32
    return %c0_i32, %c0_i32_0 : i32, i32
  }
  func.func @transform_2(%arg0: i32) -> (i32, i32) {
    %c0_i32 = arith.constant 0 : i32
    %c0_i32_0 = arith.constant 0 : i32
    %c0_i32_1 = arith.constant 0 : i32
    return %c0_i32, %c0_i32_0 : i32, i32
  }
  func.func @transform_3(%arg0: i32) -> (i32, i32) {
    %c0_i32 = arith.constant 0 : i32
    %c0_i32_0 = arith.constant 0 : i32
    %c0_i32_1 = arith.constant 0 : i32
    return %c0_i32, %c0_i32_0 : i32, i32
  }
  func.func @transform_4(%arg0: i32) -> (i32, i32) {
    %c0_i32 = arith.constant 0 : i32
    %c0_i32_0 = arith.constant 0 : i32
    %c0_i32_1 = arith.constant 0 : i32
    return %c0_i32, %c0_i32_0 : i32, i32
  }
  func.func @transform_5(%arg0: i32) -> (i32, i32, i32) {
    %c0_i32 = arith.constant 0 : i32
    %c0_i32_0 = arith.constant 0 : i32
    %c0_i32_1 = arith.constant 0 : i32
    return %arg0, %c0_i32, %c0_i32_0 : i32, i32, i32
  }
}

module attributes {stable_mosaic.version = 11 : i64} {
  func.func @sgu_fused_kernel(%arg0: i32, %arg1: memref<4x8x32xf32, #tpu.memory_space<vmem>>, %arg2: memref<8x8xbf16, #tpu.memory_space<vmem>>, %arg3: memref<8x1xf32, #tpu.memory_space<vmem>>, %arg4: memref<1x16xf32, #tpu.memory_space<vmem>>, %arg5: memref<1x16xf32, #tpu.memory_space<vmem>>, %arg6: memref<4x8x16xf32, #tpu.memory_space<vmem>>) attributes {dimension_semantics = [#tpu.dimension_semantics<parallel>], iteration_bounds = array<i64: 1>, scalar_prefetch = 0 : i64, scratch_operands = 0 : i64, tpu.core_type = #tpu.core_type<tc>, window_params = [{transform_indices = @transform_0, window_bounds = array<i64: 4, 8, 32>}, {pipeline_mode = #tpu.pipeline_mode<synchronous>, transform_indices = @transform_1, window_bounds = array<i64: 8, 8>}, {pipeline_mode = #tpu.pipeline_mode<synchronous>, transform_indices = @transform_2, window_bounds = array<i64: 8, 1>}, {pipeline_mode = #tpu.pipeline_mode<synchronous>, transform_indices = @transform_3, window_bounds = array<i64: 1, 16>}, {pipeline_mode = #tpu.pipeline_mode<synchronous>, transform_indices = @transform_4, window_bounds = array<i64: 1, 16>}, {transform_indices = @transform_5, window_bounds = array<i64: 4, 8, 16>}]} {
    %c0 = arith.constant 0 : index
    %c0_0 = arith.constant 0 : index
    %0 = vector.load %arg2[%c0, %c0_0] : memref<8x8xbf16, #tpu.memory_space<vmem>>, vector<8x8xbf16>
    %c0_1 = arith.constant 0 : index
    %c0_2 = arith.constant 0 : index
    %1 = vector.load %arg3[%c0_1, %c0_2] : memref<8x1xf32, #tpu.memory_space<vmem>>, vector<8x1xf32>
    %c0_3 = arith.constant 0 : index
    %c0_4 = arith.constant 0 : index
    %c16 = arith.constant 16 : index
    %2 = vector.load %arg1[%c0_3, %c0_4, %c16] : memref<4x8x32xf32, #tpu.memory_space<vmem>>, vector<4x8x16xf32>
    %c0_5 = arith.constant 0 : index
    %c0_6 = arith.constant 0 : index
    %3 = vector.load %arg4[%c0_5, %c0_6] : memref<1x16xf32, #tpu.memory_space<vmem>>, vector<1x16xf32>
    %c0_7 = arith.constant 0 : index
    %c0_8 = arith.constant 0 : index
    %4 = vector.load %arg5[%c0_7, %c0_8] : memref<1x16xf32, #tpu.memory_space<vmem>>, vector<1x16xf32>
    %cst = arith.constant dense<0.000000e+00> : vector<4x8xf32>
    %5 = vector.multi_reduction <add>, %2, %cst [2] : vector<4x8x16xf32> to vector<4x8xf32>
    %6 = vector.shape_cast %5 : vector<4x8xf32> to vector<4x8x1xf32>
    %7 = arith.mulf %2, %2 : vector<4x8x16xf32>
    %cst_9 = arith.constant dense<0.000000e+00> : vector<4x8xf32>
    %8 = vector.multi_reduction <add>, %7, %cst_9 [2] : vector<4x8x16xf32> to vector<4x8xf32>
    %9 = vector.shape_cast %8 : vector<4x8xf32> to vector<4x8x1xf32>
    %cst_10 = arith.constant 6.250000e-02 : f32
    %10 = vector.broadcast %cst_10 : f32 to vector<4x8x1xf32>
    %11 = arith.mulf %6, %10 : vector<4x8x1xf32>
    %cst_11 = arith.constant 6.250000e-02 : f32
    %12 = vector.broadcast %cst_11 : f32 to vector<4x8x1xf32>
    %13 = arith.mulf %9, %12 : vector<4x8x1xf32>
    %14 = arith.mulf %11, %11 : vector<4x8x1xf32>
    %15 = arith.subf %13, %14 : vector<4x8x1xf32>
    %cst_12 = arith.constant 0.000000e+00 : f32
    %16 = vector.broadcast %cst_12 : f32 to vector<4x8x1xf32>
    %17 = arith.maximumf %15, %16 : vector<4x8x1xf32>
    %18 = vector.broadcast %11 : vector<4x8x1xf32> to vector<4x8x16xf32>
    %19 = arith.subf %2, %18 : vector<4x8x16xf32>
    %cst_13 = arith.constant 9.99999974E-6 : f32
    %20 = vector.broadcast %cst_13 : f32 to vector<4x8x1xf32>
    %21 = arith.addf %17, %20 : vector<4x8x1xf32>
    %22 = math.rsqrt %21 : vector<4x8x1xf32>
    %23 = vector.broadcast %22 : vector<4x8x1xf32> to vector<4x8x16xf32>
    %24 = arith.mulf %19, %23 : vector<4x8x16xf32>
    %25 = vector.shape_cast %3 : vector<1x16xf32> to vector<1x1x16xf32>
    %26 = vector.broadcast %25 : vector<1x1x16xf32> to vector<4x8x16xf32>
    %27 = arith.mulf %24, %26 : vector<4x8x16xf32>
    %28 = vector.shape_cast %4 : vector<1x16xf32> to vector<1x1x16xf32>
    %29 = vector.broadcast %28 : vector<1x1x16xf32> to vector<4x8x16xf32>
    %30 = arith.addf %27, %29 : vector<4x8x16xf32>
    %31 = vector.extract_strided_slice %30 {offsets = [0, 0, 0], sizes = [1, 8, 16], strides = [1, 1, 1]} : vector<4x8x16xf32> to vector<1x8x16xf32>
    %32 = vector.shape_cast %31 : vector<1x8x16xf32> to vector<8x16xf32>
    %33 = vector.extract_strided_slice %30 {offsets = [1, 0, 0], sizes = [1, 8, 16], strides = [1, 1, 1]} : vector<4x8x16xf32> to vector<1x8x16xf32>
    %34 = vector.shape_cast %33 : vector<1x8x16xf32> to vector<8x16xf32>
    %35 = vector.extract_strided_slice %30 {offsets = [2, 0, 0], sizes = [1, 8, 16], strides = [1, 1, 1]} : vector<4x8x16xf32> to vector<1x8x16xf32>
    %36 = vector.shape_cast %35 : vector<1x8x16xf32> to vector<8x16xf32>
    %37 = vector.extract_strided_slice %30 {offsets = [3, 0, 0], sizes = [1, 8, 16], strides = [1, 1, 1]} : vector<4x8x16xf32> to vector<1x8x16xf32>
    %38 = vector.shape_cast %37 : vector<1x8x16xf32> to vector<8x16xf32>
    %39 = tpu.concatenate %32, %34, %36, %38 in 1 : vector<8x16xf32>, vector<8x16xf32>, vector<8x16xf32>, vector<8x16xf32> -> vector<8x64xf32>
    %40 = arith.truncf %39 : vector<8x64xf32> to vector<8x64xbf16>
    %cst_14 = arith.constant dense<0.000000e+00> : vector<8x64xf32>
    %41 = tpu.matmul %0, %40, %cst_14 {dimension_numbers = #tpu.dot_dimension_numbers<[1], [0], [0], [1], [0, 0, 1, 1], [], []>} : vector<8x8xbf16>, vector<8x64xbf16>, vector<8x64xf32> -> vector<8x64xf32>
    %c0_15 = arith.constant 0 : index
    %c0_16 = arith.constant 0 : index
    %c0_17 = arith.constant 0 : index
    %42 = vector.load %arg1[%c0_15, %c0_16, %c0_17] : memref<4x8x32xf32, #tpu.memory_space<vmem>>, vector<1x8x16xf32>
    %43 = vector.shape_cast %42 : vector<1x8x16xf32> to vector<8x16xf32>
    %44 = vector.extract_strided_slice %41 {offsets = [0, 0], sizes = [8, 16], strides = [1, 1]} : vector<8x64xf32> to vector<8x16xf32>
    %45 = vector.broadcast %1 : vector<8x1xf32> to vector<8x16xf32>
    %46 = arith.addf %44, %45 : vector<8x16xf32>
    %47 = arith.mulf %43, %46 : vector<8x16xf32>
    %c0_18 = arith.constant 0 : index
    %c0_19 = arith.constant 0 : index
    %c0_20 = arith.constant 0 : index
    %48 = vector.load %arg6[%c0_18, %c0_19, %c0_20] : memref<4x8x16xf32, #tpu.memory_space<vmem>>, vector<1x8x16xf32>
    %49 = vector.shape_cast %48 : vector<1x8x16xf32> to vector<8x16xf32>
    %50 = vector.shape_cast %47 : vector<8x16xf32> to vector<1x8x16xf32>
    tpu.vector_store %arg6[%c0_18, %c0_19, %c0_20], %50 {strides = array<i32>} : memref<4x8x16xf32, #tpu.memory_space<vmem>>, vector<1x8x16xf32>,
    %c1 = arith.constant 1 : index
    %c0_21 = arith.constant 0 : index
    %c0_22 = arith.constant 0 : index
    %51 = vector.load %arg1[%c1, %c0_21, %c0_22] : memref<4x8x32xf32, #tpu.memory_space<vmem>>, vector<1x8x16xf32>
    %52 = vector.shape_cast %51 : vector<1x8x16xf32> to vector<8x16xf32>
    %53 = vector.extract_strided_slice %41 {offsets = [0, 16], sizes = [8, 16], strides = [1, 1]} : vector<8x64xf32> to vector<8x16xf32>
    %54 = vector.broadcast %1 : vector<8x1xf32> to vector<8x16xf32>
    %55 = arith.addf %53, %54 : vector<8x16xf32>
    %56 = arith.mulf %52, %55 : vector<8x16xf32>
    %c1_23 = arith.constant 1 : index
    %c0_24 = arith.constant 0 : index
    %c0_25 = arith.constant 0 : index
    %57 = vector.load %arg6[%c1_23, %c0_24, %c0_25] : memref<4x8x16xf32, #tpu.memory_space<vmem>>, vector<1x8x16xf32>
    %58 = vector.shape_cast %57 : vector<1x8x16xf32> to vector<8x16xf32>
    %59 = vector.shape_cast %56 : vector<8x16xf32> to vector<1x8x16xf32>
    tpu.vector_store %arg6[%c1_23, %c0_24, %c0_25], %59 {strides = array<i32>} : memref<4x8x16xf32, #tpu.memory_space<vmem>>, vector<1x8x16xf32>,
    %c2 = arith.constant 2 : index
    %c0_26 = arith.constant 0 : index
    %c0_27 = arith.constant 0 : index
    %60 = vector.load %arg1[%c2, %c0_26, %c0_27] : memref<4x8x32xf32, #tpu.memory_space<vmem>>, vector<1x8x16xf32>
    %61 = vector.shape_cast %60 : vector<1x8x16xf32> to vector<8x16xf32>
    %62 = vector.extract_strided_slice %41 {offsets = [0, 32], sizes = [8, 16], strides = [1, 1]} : vector<8x64xf32> to vector<8x16xf32>
    %63 = vector.broadcast %1 : vector<8x1xf32> to vector<8x16xf32>
    %64 = arith.addf %62, %63 : vector<8x16xf32>
    %65 = arith.mulf %61, %64 : vector<8x16xf32>
    %c2_28 = arith.constant 2 : index
    %c0_29 = arith.constant 0 : index
    %c0_30 = arith.constant 0 : index
    %66 = vector.load %arg6[%c2_28, %c0_29, %c0_30] : memref<4x8x16xf32, #tpu.memory_space<vmem>>, vector<1x8x16xf32>
    %67 = vector.shape_cast %66 : vector<1x8x16xf32> to vector<8x16xf32>
    %68 = vector.shape_cast %65 : vector<8x16xf32> to vector<1x8x16xf32>
    tpu.vector_store %arg6[%c2_28, %c0_29, %c0_30], %68 {strides = array<i32>} : memref<4x8x16xf32, #tpu.memory_space<vmem>>, vector<1x8x16xf32>,
    %c3 = arith.constant 3 : index
    %c0_31 = arith.constant 0 : index
    %c0_32 = arith.constant 0 : index
    %69 = vector.load %arg1[%c3, %c0_31, %c0_32] : memref<4x8x32xf32, #tpu.memory_space<vmem>>, vector<1x8x16xf32>
    %70 = vector.shape_cast %69 : vector<1x8x16xf32> to vector<8x16xf32>
    %71 = vector.extract_strided_slice %41 {offsets = [0, 48], sizes = [8, 16], strides = [1, 1]} : vector<8x64xf32> to vector<8x16xf32>
    %72 = vector.broadcast %1 : vector<8x1xf32> to vector<8x16xf32>
    %73 = arith.addf %71, %72 : vector<8x16xf32>
    %74 = arith.mulf %70, %73 : vector<8x16xf32>
    %c3_33 = arith.constant 3 : index
    %c0_34 = arith.constant 0 : index
    %c0_35 = arith.constant 0 : index
    %75 = vector.load %arg6[%c3_33, %c0_34, %c0_35] : memref<4x8x16xf32, #tpu.memory_space<vmem>>, vector<1x8x16xf32>
    %76 = vector.shape_cast %75 : vector<1x8x16xf32> to vector<8x16xf32>
    %77 = vector.shape_cast %74 : vector<8x16xf32> to vector<1x8x16xf32>
    tpu.vector_store %arg6[%c3_33, %c0_34, %c0_35], %77 {strides = array<i32>} : memref<4x8x16xf32, #tpu.memory_space<vmem>>, vector<1x8x16xf32>,
    return
  }
  func.func @transform_0(%arg0: i32) -> (i32, i32, i32) {
    %c0_i32 = arith.constant 0 : i32
    %c0_i32_0 = arith.constant 0 : i32
    %c0_i32_1 = arith.constant 0 : i32
    return %arg0, %c0_i32, %c0_i32_0 : i32, i32, i32
  }
  func.func @transform_1(%arg0: i32) -> (i32, i32) {
    %c0_i32 = arith.constant 0 : i32
    %c0_i32_0 = arith.constant 0 : i32
    %c0_i32_1 = arith.constant 0 : i32
    return %c0_i32, %c0_i32_0 : i32, i32
  }
  func.func @transform_2(%arg0: i32) -> (i32, i32) {
    %c0_i32 = arith.constant 0 : i32
    %c0_i32_0 = arith.constant 0 : i32
    %c0_i32_1 = arith.constant 0 : i32
    return %c0_i32, %c0_i32_0 : i32, i32
  }
  func.func @transform_3(%arg0: i32) -> (i32, i32) {
    %c0_i32 = arith.constant 0 : i32
    %c0_i32_0 = arith.constant 0 : i32
    %c0_i32_1 = arith.constant 0 : i32
    return %c0_i32, %c0_i32_0 : i32, i32
  }
  func.func @transform_4(%arg0: i32) -> (i32, i32) {
    %c0_i32 = arith.constant 0 : i32
    %c0_i32_0 = arith.constant 0 : i32
    %c0_i32_1 = arith.constant 0 : i32
    return %c0_i32, %c0_i32_0 : i32, i32
  }
  func.func @transform_5(%arg0: i32) -> (i32, i32, i32) {
    %c0_i32 = arith.constant 0 : i32
    %c0_i32_0 = arith.constant 0 : i32
    %c0_i32_1 = arith.constant 0 : i32
    return %arg0, %c0_i32, %c0_i32_0 : i32, i32, i32
  }
}

</mosaic_0001>

<bundles_post_ra>
// kernel: tpu_custom_call.1
= control target key start
LH: loop header
LB: loop body
LE: loop exit
PB: predicated region body
PF: predicated region fallthrough
CT: control target
= control target key end

     0   :  { %10 = vsyncpa [#allocation3], 0  ;;  %s500_s0 = inlined_call_operand.hbm [shape: f32[4,8,32], index: 0, kind: input, shape index: {}]   ;;  %s501_s1 = inlined_call_operand.vmem [shape: bf16[8,8], index: 1, kind: input, shape index: {}]   ;;  %s502_s2 = inlined_call_operand.vmem [shape: f32[8,1], index: 2, kind: input, shape index: {}]   ;;  %s503_s3 = inlined_call_operand.vmem [shape: f32[1,16], index: 3, kind: input, shape index: {}]   ;;  %s504_s4 = inlined_call_operand.vmem [shape: f32[1,16], index: 4, kind: input, shape index: {}]   ;;  %s505_s5 = inlined_call_operand.hbm [shape: f32[4,8,16], index: 5, kind: output, shape index: {}]  }
   0x1   :  { %11 = vsyncpa [#allocation4], 0  ;;  %s362_s18 = smov [#allocation2]   ;;  %s314_s22 = scalar_lea.hbm %s500_s0, 512 }
   0x2   :  { %s17_s19 = sshll.u32 %s362_s18, 4  ;;  %p315_p0 = scmp.ne.s32.totalorder %s500_s0, %s314_s22  ;;  %s18_s19 = int_to_ptr.vmem [resolvable:$true] %s17_s19 }
   0x3   :  { %p318_p1 = scmp.lt.u32.totalorder %s314_s22, %s500_s0 }
   0x5   :  { %p320_p2 = pnand %p318_p1, %p315_p0 }
   0x7   :  { %323 = shalt.err (!%p320_p2)
}
   0x8   :  { %s324_s27 = scalar_lea.vmem %s18_s19, 512  ;;  %p329_p4 = scmp.lt.s32.totalorder %s18_s19, %s18_s19 }
   0x9   :  { %p325_p3 = scmp.ne.s32.totalorder %s18_s19, %s324_s27  ;;  %p330_p5 = scmp.lt.s32.totalorder %s324_s27, %s324_s27 }
   0xb   :  { %p331_p6 = por %p330_p5, %p329_p4 }
   0xd   :  { %p332_p7 = pnand %p331_p6, %p325_p3 }
   0xf   :  { %335 = shalt.err (!%p332_p7)
}
  0x10   :  { %s363_s28 = smov 128   ;;  %s364_s29 = smov 8  }
  0x11   :  { %23 = dma.hbm_to_vmem [thread:$0]  %s500_s0, 512, %s18_s19, [#allocation3], %s363_s28, %s363_s28, %s364_s29  }
  0x12   :  { %358 = dma.done.wait [#allocation3], 512  }
  0x13   :  { %359 = vsyncadd [#allocation3], 4294966784  ;;  %v419_v0 = vld [vmem:[#allocation2] sm:$0xff]  ;;  %v421_v1 = vld [vmem:[#allocation2 + $0x18] sm:$0xff]  ;;  %s365_s7 = smov 112   ;;  %vm60_vm0 = vcmask 130048  }
  0x14   :  { %48 = vrot.lane.b32.xlu0 %v419_v0, %s365_s7  ;;  %54 = vrot.lane.b32.xlu1 %v421_v1, %s365_s7  ;;  %v73_v2 = vmul.f32 %v419_v0, %v419_v0  ;;  %v429_v3 = vld [vmem:[#allocation2 + $0x10] sm:$0xff]  ;;  %v76_v5 = vmul.f32 %v421_v1, %v421_v1  ;;  %v440_v6 = vld [vmem:[#allocation2 + $0x8] sm:$0xff]  ;;  %v283_v20 = vld [vmem:[%s504_s4] ss:$0 sm:$0xff]  ;;  %s366_s11 = smov 16   ;;  %vm369_vm1 = vmmov 0  }
  0x15   :  { %v75_v4 = vmul.f32 %v429_v3, %v429_v3  ;;  %v74_v19 = vmul.f32 %v440_v6, %v440_v6  ;;  %v282_v21 = vld [vmem:[%s503_s3] ss:$0 sm:$0xff]  ;;  %s367_s3 = smov 32   ;;  %vm178_vm2 = vcmask 261120   ;;  %vm180_vm3 = vcmask 392192   ;;  %s371_s14 = smov 96  }
  0x16   :  { %vm187_vm4 = vcmask 1043456   ;;  %vm183_vm5 = vcmask 64512   ;;  %s372_s15 = smov 80  }
  0x18   :  { %52 = vrot.lane.b32.xlu0 %v429_v3, %s365_s7  ;;  %81 = vrot.lane.b32.xlu1 %v73_v2, %s365_s7 }
  0x1c   :  { %85 = vrot.lane.b32.xlu0 %v75_v4, %s365_s7  ;;  %87 = vrot.lane.b32.xlu1 %v76_v5, %s365_s7 }
  0x20   :  { %50 = vrot.lane.b32.xlu0 %v440_v6, %s365_s7 }
  0x86   :  { %v49_v7 = vpop.permute.xlu0 %48  ;;  %v55_v8 = vpop.permute.xlu1 %54 }
  0x87   :  { %v61_v9 = vsel %vm60_vm0, %v49_v7, 0.0  ;;  %v70_v10 = vsel %vm60_vm0, %v55_v8, 0.0  ;;  %v368_v7 = vmov 0.0   ;;  %v37_v8 = vld [vmem:[%s502_s2] sm:$0xff] }
  0x88   :  { %62 = vadd.xlane.f32.xlu1 %v61_v9  ;;  %287 = vmatprep.subr.bf16.mxu0 %v368_v7  ;;  %v370_v9 = vmov 0  }
  0x89   :  { %289 = vmatprep.mubr.msk.bf16.mxu0 %vm369_vm1, %v368_v7  ;;  %305 = vset.pattern.permute.xlu0 %v370_v9 }
  0x8a   :  { %v53_v11 = vpop.permute.xlu0 %52  ;;  %v82_v12 = vpop.permute.xlu1 %81 }
  0x8b   :  { %v67_v13 = vsel %vm60_vm0, %v53_v11, 0.0  ;;  %v93_v14 = vsel %vm60_vm0, %v82_v12, 0.0 }
  0x8c   :  { %68 = vadd.xlane.f32.xlu0 %v67_v13  ;;  %71 = vadd.xlane.f32.xlu1 %v70_v10 }
  0x8e   :  { %v86_v15 = vpop.permute.xlu0 %85  ;;  %v88_v17 = vpop.permute.xlu1 %87 }
  0x8f   :  { %v99_v16 = vsel %vm60_vm0, %v86_v15, 0.0  ;;  %v102_v18 = vsel %vm60_vm0, %v88_v17, 0.0 }
  0x90   :  { %94 = vadd.xlane.f32.xlu1 %v93_v14 }
  0x92   :  { %v51_v22 = vpop.permute.xlu0 %50 }
  0x93   :  { %v64_v23 = vsel %vm60_vm0, %v51_v22, 0.0 }
  0x94   :  { %100 = vadd.xlane.f32.xlu1 %v99_v16 }
  0x98   :  { %103 = vadd.xlane.f32.xlu1 %v102_v18 }
  0xa2   :  { %83 = vrot.lane.b32.xlu0 %v74_v19, %s365_s7 }
  0xa6   :  { %158 = vrot.lane.b32.xlu0 %v283_v20, %s366_s11 }
  0xa9   :  { %146 = vrot.lane.b32.xlu1 %v282_v21, %s366_s11 }
  0xc5   :  { %65 = vadd.xlane.f32.xlu0 %v64_v23 }
 0x115   :  { %v63_v24 = vpop.xlane.xlu1 %62 }
 0x116   :  { %v105_v27 = vmul.f32 0.0625, %v63_v24 }
 0x118   :  { %v113_v30 = vmul.f32 %v105_v27, %v105_v27  ;;  %v125_v50 = vsub.f32 %v419_v0, %v105_v27 }
 0x119   :  { %v69_v25 = vpop.xlane.xlu0 %68  ;;  %v72_v26 = vpop.xlane.xlu1 %71 }
 0x11a   :  { %v107_v31 = vmul.f32 0.0625, %v69_v25  ;;  %v108_v34 = vmul.f32 0.0625, %v72_v26 }
 0x11c   :  { %v115_v37 = vmul.f32 %v107_v31, %v107_v31  ;;  %v116_v40 = vmul.f32 %v108_v34, %v108_v34  ;;  %v127_v55 = vsub.f32 %v429_v3, %v107_v31  ;;  %v128_v60 = vsub.f32 %v421_v1, %v108_v34  ;;  %v36_v31 = vld [vmem:[%s501_s1] sm:$0xf]  ;;  %s373_s1 = smov [#allocation5]  }
 0x11d   :  { %v84_v28 = vpop.permute.xlu0 %83  ;;  %v95_v29 = vpop.xlane.xlu1 %94  ;;  %s270_s16 = sshll.u32 %s373_s1, 4  ;;  %s271_s16 = int_to_ptr.vmem [resolvable:$true] %s270_s16 }
 0x11e   :  { %v109_v32 = vmul.f32 0.0625, %v95_v29  ;;  %v96_v33 = vsel %vm60_vm0, %v84_v28, 0.0  ;;  %s336_s17 = scalar_lea.vmem %s271_s16, 512  ;;  %p341_p9 = scmp.lt.s32.totalorder %s271_s16, %s271_s16 }
 0x11f   :  { %97 = vadd.xlane.f32.xlu1 %v96_v33  ;;  %p337_p8 = scmp.ne.s32.totalorder %s271_s16, %s336_s17  ;;  %p342_p10 = scmp.lt.s32.totalorder %s336_s17, %s336_s17 }
 0x120   :  { %v117_v35 = vsub.f32 %v109_v32, %v113_v30 }
 0x121   :  { %v101_v36 = vpop.xlane.xlu1 %100  ;;  %v159_v54 = vpop.permute.xlu0 %158  ;;  %p343_p11 = por %p342_p10, %p341_p9 }
 0x122   :  { %v121_v38 = vmax.f32 %v117_v35, 0.0  ;;  %v111_v39 = vmul.f32 0.0625, %v101_v36 }
 0x123   :  { %p344_p12 = pnand %p343_p11, %p337_p8 }
 0x124   :  { %v129_v41 = vadd.f32 1e-05, %v121_v38  ;;  %v119_v42 = vsub.f32 %v111_v39, %v115_v37 }
 0x125   :  { %v104_v43 = vpop.xlane.xlu1 %103 }
 0x126   :  { %306 = vrsqrt.f32 %v129_v41  ;;  %v123_v44 = vmax.f32 %v119_v42, 0.0  ;;  %v112_v45 = vmul.f32 0.0625, %v104_v43 }
 0x128   :  { %v131_v46 = vadd.f32 1e-05, %v123_v44  ;;  %v120_v47 = vsub.f32 %v112_v45, %v116_v40 }
 0x129   :  { %v147_v52 = vpop.permute.xlu1 %146 }
 0x12a   :  { %308 = vrsqrt.f32 %v131_v46  ;;  %v124_v48 = vmax.f32 %v120_v47, 0.0 }
 0x12c   :  { %v132_v49 = vadd.f32 1e-05, %v124_v48 }
 0x12e   :  { %310 = vrsqrt.f32 %v132_v49 }
 0x130   :  { %v307_v51 = vpop.eup %306 }
 0x131   :  { %v137_v53 = vmul.f32 %v307_v51, %v125_v50 }
 0x133   :  { %v149_v56 = vmul.f32 %v147_v52, %v137_v53 }
 0x134   :  { %v309_v57 = vpop.eup %308 }
 0x135   :  { %v139_v58 = vmul.f32 %v309_v57, %v127_v55  ;;  %v161_v59 = vadd.f32 %v159_v54, %v149_v56 }
 0x137   :  { %v151_v61 = vmul.f32 %v147_v52, %v139_v58  ;;  %166 = vrot.lane.b32.xlu0 %v161_v59, %s365_s7 }
 0x138   :  { %v311_v62 = vpop.eup %310 }
 0x139   :  { %v140_v63 = vmul.f32 %v311_v62, %v128_v60  ;;  %v163_v2 = vadd.f32 %v159_v54, %v151_v61 }
 0x13b   :  { %v152_v4 = vmul.f32 %v147_v52, %v140_v63  ;;  %170 = vrot.lane.b32.xlu1 %v163_v2, %s366_s11 }
 0x13d   :  { %v164_v5 = vadd.f32 %v159_v54, %v152_v4 }
 0x13f   :  { %174 = vrot.lane.b32.xlu0 %v164_v5, %s367_s3 }
 0x143   :  { %234 = vperm.xlu0 %305, %v37_v8  }
 0x152   :  { %v66_v10 = vpop.xlane.xlu0 %65 }
 0x153   :  { %v106_v11 = vmul.f32 0.0625, %v66_v10 }
 0x155   :  { %v114_v13 = vmul.f32 %v106_v11, %v106_v11  ;;  %v126_v18 = vsub.f32 %v440_v6, %v106_v11 }
 0x1a9   :  { %v167_v22 = vpop.permute.xlu0 %166 }
 0x1ac   :  { %v98_v12 = vpop.xlane.xlu1 %97 }
 0x1ad   :  { %v110_v14 = vmul.f32 0.0625, %v98_v12 }
 0x1af   :  { %v118_v15 = vsub.f32 %v110_v14, %v114_v13 }
 0x1b0   :  { %v171_v25 = vpop.permute.xlu1 %170 }
 0x1b1   :  { %v122_v16 = vmax.f32 %v118_v15, 0.0  ;;  %v175_v27 = vpop.permute.xlu0 %174 }
 0x1b3   :  { %v130_v17 = vadd.f32 1e-05, %v122_v16 }
 0x1b5   :  { %312 = vrsqrt.f32 %v130_v17 }
 0x1bf   :  { %v313_v19 = vpop.eup %312 }
 0x1c0   :  { %v138_v20 = vmul.f32 %v313_v19, %v126_v18 }
 0x1c2   :  { %v150_v21 = vmul.f32 %v147_v52, %v138_v20  ;;  %v235_v32 = vpop.permute.xlu0 %234 }
 0x1c4   :  { %v162_v23 = vadd.f32 %v159_v54, %v150_v21 }
 0x1c6   :  { %v177_v24 = vsel %vm60_vm0, %v167_v22, %v162_v23 }
 0x1c7   :  { %v179_v26 = vsel %vm178_vm2, %v177_v24, %v171_v25 }
 0x1c8   :  { %v181_v28 = vsel %vm180_vm3, %v179_v26, %v175_v27 }
 0x1c9   :  { %v182_v29 = vpack.c.bf16 %v181_v28, %v181_v28 }
 0x1cb   :  { %v189_v30 = vsel %vm187_vm4, %v182_v29, 0 }
 0x1cc   :  { %288 = vmatpush3.bf16.msra.mxu0 %v189_v30 }
 0x1cf   :  { %290 = vmatmul.mubr.msk.bf16.vlgmr.msra.gmra.mrb[0].mxu0 %vm183_vm5, %v36_v31 }
 0x2a2   :  { %v225_v33 = vpop.f32.mrb[0].mxu0 }
 0x2a3   :  { %v237_v34 = vadd.f32 %v235_v32, %v225_v33  ;;  %v291_v35 = vpop.f32.mrb[1].mxu0 }
 0x2a4   :  { %v228_v36 = vpop.f32.mrb[2].mxu0 }
 0x2a5   :  { %v238_v37 = vmul.f32 %v237_v34, %v419_v0  ;;  %251 = vrot.lane.b32.xlu0 %v237_v34, %s371_s14  ;;  %243 = vrot.lane.b32.xlu1 %v237_v34, %s365_s7  ;;  %v292_v38 = vpop.f32.mrb[3].mxu0 }
 0x2a7   :  { %239 = vst.msk [vmem:[#allocation5] sm:$0xff] %vm60_vm0, %v238_v37 }
 0x2a9   :  { %259 = vrot.lane.b32.xlu1 %v237_v34, %s372_s15 }
 0x317   :  { %v252_v39 = vpop.permute.xlu0 %251  ;;  %v244_v40 = vpop.permute.xlu1 %243 }
 0x318   :  { %v254_v41 = vmul.f32 %v252_v39, %v429_v3  ;;  %v246_v42 = vmul.f32 %v244_v40, %v440_v6 }
 0x31a   :  { %256 = vst.msk [vmem:[#allocation5 + $0x10] sm:$0xff] %vm60_vm0, %v254_v41  ;;  %248 = vst.msk [vmem:[#allocation5 + $0x8] sm:$0xff] %vm60_vm0, %v246_v42 }
 0x31b   :  { %v260_v0 = vpop.permute.xlu1 %259 }
 0x31c   :  { %v262_v43 = vmul.f32 %v260_v0, %v421_v1 }
 0x31e   :  { %264 = vst.msk [vmem:[#allocation5 + $0x18] sm:$0xff] %vm60_vm0, %v262_v43 }
 0x31f   :  { %347 = shalt.err (!%p344_p12)
}
 0x320   :  { %s348_s20 = scalar_lea.hbm %s505_s5, 512 }
 0x321   :  { %p349_p13 = scmp.ne.s32.totalorder %s505_s5, %s348_s20  ;;  %p352_p0 = scmp.lt.u32.totalorder %s348_s20, %s505_s5 }
 0x323   :  { %p354_p1 = pnand %p352_p0, %p349_p13 }
 0x325   :  { %357 = shalt.err (!%p354_p1)
}
 0x326   :  { %276 = dma.vmem_to_hbm [thread:$0]  %s271_s16, 512, %s505_s5, [#allocation4], %s363_s28, %s363_s28, %s364_s29  }
 0x327   :  { %360 = dma.done.wait [#allocation4], 512  }
 0x328   :  { %361 = vsyncadd [#allocation4], 4294966784 }
 0x329   :  { %280 = vsyncpa [#allocation3], 1 }
 0x32a   :  { %281 = vsyncpa [#allocation4], 1 }

// kernel: tpu_custom_call.1
= control target key start
LH: loop header
LB: loop body
LE: loop exit
PB: predicated region body
PF: predicated region fallthrough
CT: control target
= control target key end

     0   :  { %10 = vsyncpa [#allocation3], 0  ;;  %s500_s0 = inlined_call_operand.hbm [shape: f32[4,8,32], index: 0, kind: input, shape index: {}]   ;;  %s501_s1 = inlined_call_operand.vmem [shape: bf16[8,8], index: 1, kind: input, shape index: {}]   ;;  %s502_s2 = inlined_call_operand.vmem [shape: f32[8,1], index: 2, kind: input, shape index: {}]   ;;  %s503_s3 = inlined_call_operand.vmem [shape: f32[1,16], index: 3, kind: input, shape index: {}]   ;;  %s504_s4 = inlined_call_operand.vmem [shape: f32[1,16], index: 4, kind: input, shape index: {}]   ;;  %s505_s5 = inlined_call_operand.hbm [shape: f32[4,8,16], index: 5, kind: output, shape index: {}]  }
   0x1   :  { %11 = vsyncpa [#allocation4], 0  ;;  %s362_s18 = smov [#allocation2]   ;;  %s314_s22 = scalar_lea.hbm %s500_s0, 512 }
   0x2   :  { %s17_s19 = sshll.u32 %s362_s18, 4  ;;  %p315_p0 = scmp.ne.s32.totalorder %s500_s0, %s314_s22  ;;  %s18_s19 = int_to_ptr.vmem [resolvable:$true] %s17_s19 }
   0x3   :  { %p318_p1 = scmp.lt.u32.totalorder %s314_s22, %s500_s0 }
   0x5   :  { %p320_p2 = pnand %p318_p1, %p315_p0 }
   0x7   :  { %323 = shalt.err (!%p320_p2)
}
   0x8   :  { %s324_s27 = scalar_lea.vmem %s18_s19, 512  ;;  %p329_p4 = scmp.lt.s32.totalorder %s18_s19, %s18_s19 }
   0x9   :  { %p325_p3 = scmp.ne.s32.totalorder %s18_s19, %s324_s27  ;;  %p330_p5 = scmp.lt.s32.totalorder %s324_s27, %s324_s27 }
   0xb   :  { %p331_p6 = por %p330_p5, %p329_p4 }
   0xd   :  { %p332_p7 = pnand %p331_p6, %p325_p3 }
   0xf   :  { %335 = shalt.err (!%p332_p7)
}
  0x10   :  { %s363_s28 = smov 128   ;;  %s364_s29 = smov 8  }
  0x11   :  { %23 = dma.hbm_to_vmem [thread:$0]  %s500_s0, 512, %s18_s19, [#allocation3], %s363_s28, %s363_s28, %s364_s29  }
  0x12   :  { %358 = dma.done.wait [#allocation3], 512  }
  0x13   :  { %359 = vsyncadd [#allocation3], 4294966784  ;;  %v419_v0 = vld [vmem:[#allocation2] sm:$0xff]  ;;  %v421_v1 = vld [vmem:[#allocation2 + $0x18] sm:$0xff]  ;;  %s365_s7 = smov 112   ;;  %vm60_vm0 = vcmask 130048  }
  0x14   :  { %48 = vrot.lane.b32.xlu0 %v419_v0, %s365_s7  ;;  %54 = vrot.lane.b32.xlu1 %v421_v1, %s365_s7  ;;  %v73_v2 = vmul.f32 %v419_v0, %v419_v0  ;;  %v429_v3 = vld [vmem:[#allocation2 + $0x10] sm:$0xff]  ;;  %v76_v5 = vmul.f32 %v421_v1, %v421_v1  ;;  %v440_v6 = vld [vmem:[#allocation2 + $0x8] sm:$0xff]  ;;  %v283_v20 = vld [vmem:[%s504_s4] ss:$0 sm:$0xff]  ;;  %s366_s11 = smov 16   ;;  %vm369_vm1 = vmmov 0  }
  0x15   :  { %v75_v4 = vmul.f32 %v429_v3, %v429_v3  ;;  %v74_v19 = vmul.f32 %v440_v6, %v440_v6  ;;  %v282_v21 = vld [vmem:[%s503_s3] ss:$0 sm:$0xff]  ;;  %s367_s3 = smov 32   ;;  %vm178_vm2 = vcmask 261120   ;;  %vm180_vm3 = vcmask 392192   ;;  %s371_s14 = smov 96  }
  0x16   :  { %vm187_vm4 = vcmask 1043456   ;;  %vm183_vm5 = vcmask 64512   ;;  %s372_s15 = smov 80  }
  0x18   :  { %52 = vrot.lane.b32.xlu0 %v429_v3, %s365_s7  ;;  %81 = vrot.lane.b32.xlu1 %v73_v2, %s365_s7 }
  0x1c   :  { %85 = vrot.lane.b32.xlu0 %v75_v4, %s365_s7  ;;  %87 = vrot.lane.b32.xlu1 %v76_v5, %s365_s7 }
  0x20   :  { %50 = vrot.lane.b32.xlu0 %v440_v6, %s365_s7 }
  0x86   :  { %v49_v7 = vpop.permute.xlu0 %48  ;;  %v55_v8 = vpop.permute.xlu1 %54 }
  0x87   :  { %v61_v9 = vsel %vm60_vm0, %v49_v7, 0.0  ;;  %v70_v10 = vsel %vm60_vm0, %v55_v8, 0.0  ;;  %v368_v7 = vmov 0.0   ;;  %v37_v8 = vld [vmem:[%s502_s2] sm:$0xff] }
  0x88   :  { %62 = vadd.xlane.f32.xlu1 %v61_v9  ;;  %287 = vmatprep.subr.bf16.mxu0 %v368_v7  ;;  %v370_v9 = vmov 0  }
  0x89   :  { %289 = vmatprep.mubr.msk.bf16.mxu0 %vm369_vm1, %v368_v7  ;;  %305 = vset.pattern.permute.xlu0 %v370_v9 }
  0x8a   :  { %v53_v11 = vpop.permute.xlu0 %52  ;;  %v82_v12 = vpop.permute.xlu1 %81 }
  0x8b   :  { %v67_v13 = vsel %vm60_vm0, %v53_v11, 0.0  ;;  %v93_v14 = vsel %vm60_vm0, %v82_v12, 0.0 }
  0x8c   :  { %68 = vadd.xlane.f32.xlu0 %v67_v13  ;;  %71 = vadd.xlane.f32.xlu1 %v70_v10 }
  0x8e   :  { %v86_v15 = vpop.permute.xlu0 %85  ;;  %v88_v17 = vpop.permute.xlu1 %87 }
  0x8f   :  { %v99_v16 = vsel %vm60_vm0, %v86_v15, 0.0  ;;  %v102_v18 = vsel %vm60_vm0, %v88_v17, 0.0 }
  0x90   :  { %94 = vadd.xlane.f32.xlu1 %v93_v14 }
  0x92   :  { %v51_v22 = vpop.permute.xlu0 %50 }
  0x93   :  { %v64_v23 = vsel %vm60_vm0, %v51_v22, 0.0 }
  0x94   :  { %100 = vadd.xlane.f32.xlu1 %v99_v16 }
  0x98   :  { %103 = vadd.xlane.f32.xlu1 %v102_v18 }
  0xa2   :  { %83 = vrot.lane.b32.xlu0 %v74_v19, %s365_s7 }
  0xa6   :  { %158 = vrot.lane.b32.xlu0 %v283_v20, %s366_s11 }
  0xa9   :  { %146 = vrot.lane.b32.xlu1 %v282_v21, %s366_s11 }
  0xc5   :  { %65 = vadd.xlane.f32.xlu0 %v64_v23 }
 0x115   :  { %v63_v24 = vpop.xlane.xlu1 %62 }
 0x116   :  { %v105_v27 = vmul.f32 0.0625, %v63_v24 }
 0x118   :  { %v113_v30 = vmul.f32 %v105_v27, %v105_v27  ;;  %v125_v50 = vsub.f32 %v419_v0, %v105_v27 }
 0x119   :  { %v69_v25 = vpop.xlane.xlu0 %68  ;;  %v72_v26 = vpop.xlane.xlu1 %71 }
 0x11a   :  { %v107_v31 = vmul.f32 0.0625, %v69_v25  ;;  %v108_v34 = vmul.f32 0.0625, %v72_v26 }
 0x11c   :  { %v115_v37 = vmul.f32 %v107_v31, %v107_v31  ;;  %v116_v40 = vmul.f32 %v108_v34, %v108_v34  ;;  %v127_v55 = vsub.f32 %v429_v3, %v107_v31  ;;  %v128_v60 = vsub.f32 %v421_v1, %v108_v34  ;;  %v36_v31 = vld [vmem:[%s501_s1] sm:$0xf]  ;;  %s373_s1 = smov [#allocation5]  }
 0x11d   :  { %v84_v28 = vpop.permute.xlu0 %83  ;;  %v95_v29 = vpop.xlane.xlu1 %94  ;;  %s270_s16 = sshll.u32 %s373_s1, 4  ;;  %s271_s16 = int_to_ptr.vmem [resolvable:$true] %s270_s16 }
 0x11e   :  { %v109_v32 = vmul.f32 0.0625, %v95_v29  ;;  %v96_v33 = vsel %vm60_vm0, %v84_v28, 0.0  ;;  %s336_s17 = scalar_lea.vmem %s271_s16, 512  ;;  %p341_p9 = scmp.lt.s32.totalorder %s271_s16, %s271_s16 }
 0x11f   :  { %97 = vadd.xlane.f32.xlu1 %v96_v33  ;;  %p337_p8 = scmp.ne.s32.totalorder %s271_s16, %s336_s17  ;;  %p342_p10 = scmp.lt.s32.totalorder %s336_s17, %s336_s17 }
 0x120   :  { %v117_v35 = vsub.f32 %v109_v32, %v113_v30 }
 0x121   :  { %v101_v36 = vpop.xlane.xlu1 %100  ;;  %v159_v54 = vpop.permute.xlu0 %158  ;;  %p343_p11 = por %p342_p10, %p341_p9 }
 0x122   :  { %v121_v38 = vmax.f32 %v117_v35, 0.0  ;;  %v111_v39 = vmul.f32 0.0625, %v101_v36 }
 0x123   :  { %p344_p12 = pnand %p343_p11, %p337_p8 }
 0x124   :  { %v129_v41 = vadd.f32 1e-05, %v121_v38  ;;  %v119_v42 = vsub.f32 %v111_v39, %v115_v37 }
 0x125   :  { %v104_v43 = vpop.xlane.xlu1 %103 }
 0x126   :  { %306 = vrsqrt.f32 %v129_v41  ;;  %v123_v44 = vmax.f32 %v119_v42, 0.0  ;;  %v112_v45 = vmul.f32 0.0625, %v104_v43 }
 0x128   :  { %v131_v46 = vadd.f32 1e-05, %v123_v44  ;;  %v120_v47 = vsub.f32 %v112_v45, %v116_v40 }
 0x129   :  { %v147_v52 = vpop.permute.xlu1 %146 }
 0x12a   :  { %308 = vrsqrt.f32 %v131_v46  ;;  %v124_v48 = vmax.f32 %v120_v47, 0.0 }
 0x12c   :  { %v132_v49 = vadd.f32 1e-05, %v124_v48 }
 0x12e   :  { %310 = vrsqrt.f32 %v132_v49 }
 0x130   :  { %v307_v51 = vpop.eup %306 }
 0x131   :  { %v137_v53 = vmul.f32 %v307_v51, %v125_v50 }
 0x133   :  { %v149_v56 = vmul.f32 %v147_v52, %v137_v53 }
 0x134   :  { %v309_v57 = vpop.eup %308 }
 0x135   :  { %v139_v58 = vmul.f32 %v309_v57, %v127_v55  ;;  %v161_v59 = vadd.f32 %v159_v54, %v149_v56 }
 0x137   :  { %v151_v61 = vmul.f32 %v147_v52, %v139_v58  ;;  %166 = vrot.lane.b32.xlu0 %v161_v59, %s365_s7 }
 0x138   :  { %v311_v62 = vpop.eup %310 }
 0x139   :  { %v140_v63 = vmul.f32 %v311_v62, %v128_v60  ;;  %v163_v2 = vadd.f32 %v159_v54, %v151_v61 }
 0x13b   :  { %v152_v4 = vmul.f32 %v147_v52, %v140_v63  ;;  %170 = vrot.lane.b32.xlu1 %v163_v2, %s366_s11 }
 0x13d   :  { %v164_v5 = vadd.f32 %v159_v54, %v152_v4 }
 0x13f   :  { %174 = vrot.lane.b32.xlu0 %v164_v5, %s367_s3 }
 0x143   :  { %234 = vperm.xlu0 %305, %v37_v8  }
 0x152   :  { %v66_v10 = vpop.xlane.xlu0 %65 }
 0x153   :  { %v106_v11 = vmul.f32 0.0625, %v66_v10 }
 0x155   :  { %v114_v13 = vmul.f32 %v106_v11, %v106_v11  ;;  %v126_v18 = vsub.f32 %v440_v6, %v106_v11 }
 0x1a9   :  { %v167_v22 = vpop.permute.xlu0 %166 }
 0x1ac   :  { %v98_v12 = vpop.xlane.xlu1 %97 }
 0x1ad   :  { %v110_v14 = vmul.f32 0.0625, %v98_v12 }
 0x1af   :  { %v118_v15 = vsub.f32 %v110_v14, %v114_v13 }
 0x1b0   :  { %v171_v25 = vpop.permute.xlu1 %170 }
 0x1b1   :  { %v122_v16 = vmax.f32 %v118_v15, 0.0  ;;  %v175_v27 = vpop.permute.xlu0 %174 }
 0x1b3   :  { %v130_v17 = vadd.f32 1e-05, %v122_v16 }
 0x1b5   :  { %312 = vrsqrt.f32 %v130_v17 }
 0x1bf   :  { %v313_v19 = vpop.eup %312 }
 0x1c0   :  { %v138_v20 = vmul.f32 %v313_v19, %v126_v18 }
 0x1c2   :  { %v150_v21 = vmul.f32 %v147_v52, %v138_v20  ;;  %v235_v32 = vpop.permute.xlu0 %234 }
 0x1c4   :  { %v162_v23 = vadd.f32 %v159_v54, %v150_v21 }
 0x1c6   :  { %v177_v24 = vsel %vm60_vm0, %v167_v22, %v162_v23 }
 0x1c7   :  { %v179_v26 = vsel %vm178_vm2, %v177_v24, %v171_v25 }
 0x1c8   :  { %v181_v28 = vsel %vm180_vm3, %v179_v26, %v175_v27 }
 0x1c9   :  { %v182_v29 = vpack.c.bf16 %v181_v28, %v181_v28 }
 0x1cb   :  { %v189_v30 = vsel %vm187_vm4, %v182_v29, 0 }
 0x1cc   :  { %288 = vmatpush3.bf16.msra.mxu0 %v189_v30 }
 0x1cf   :  { %290 = vmatmul.mubr.msk.bf16.vlgmr.msra.gmra.mrb[0].mxu0 %vm183_vm5, %v36_v31 }
 0x2a2   :  { %v225_v33 = vpop.f32.mrb[0].mxu0 }
 0x2a3   :  { %v237_v34 = vadd.f32 %v235_v32, %v225_v33  ;;  %v291_v35 = vpop.f32.mrb[1].mxu0 }
 0x2a4   :  { %v228_v36 = vpop.f32.mrb[2].mxu0 }
 0x2a5   :  { %v238_v37 = vmul.f32 %v237_v34, %v419_v0  ;;  %251 = vrot.lane.b32.xlu0 %v237_v34, %s371_s14  ;;  %243 = vrot.lane.b32.xlu1 %v237_v34, %s365_s7  ;;  %v292_v38 = vpop.f32.mrb[3].mxu0 }
 0x2a7   :  { %239 = vst.msk [vmem:[#allocation5] sm:$0xff] %vm60_vm0, %v238_v37 }
 0x2a9   :  { %259 = vrot.lane.b32.xlu1 %v237_v34, %s372_s15 }
 0x317   :  { %v252_v39 = vpop.permute.xlu0 %251  ;;  %v244_v40 = vpop.permute.xlu1 %243 }
 0x318   :  { %v254_v41 = vmul.f32 %v252_v39, %v429_v3  ;;  %v246_v42 = vmul.f32 %v244_v40, %v440_v6 }
 0x31a   :  { %256 = vst.msk [vmem:[#allocation5 + $0x10] sm:$0xff] %vm60_vm0, %v254_v41  ;;  %248 = vst.msk [vmem:[#allocation5 + $0x8] sm:$0xff] %vm60_vm0, %v246_v42 }
 0x31b   :  { %v260_v0 = vpop.permute.xlu1 %259 }
 0x31c   :  { %v262_v43 = vmul.f32 %v260_v0, %v421_v1 }
 0x31e   :  { %264 = vst.msk [vmem:[#allocation5 + $0x18] sm:$0xff] %vm60_vm0, %v262_v43 }
 0x31f   :  { %347 = shalt.err (!%p344_p12)
}
 0x320   :  { %s348_s20 = scalar_lea.hbm %s505_s5, 512 }
 0x321   :  { %p349_p13 = scmp.ne.s32.totalorder %s505_s5, %s348_s20  ;;  %p352_p0 = scmp.lt.u32.totalorder %s348_s20, %s505_s5 }
 0x323   :  { %p354_p1 = pnand %p352_p0, %p349_p13 }
 0x325   :  { %357 = shalt.err (!%p354_p1)
}
 0x326   :  { %276 = dma.vmem_to_hbm [thread:$0]  %s271_s16, 512, %s505_s5, [#allocation4], %s363_s28, %s363_s28, %s364_s29  }
 0x327   :  { %360 = dma.done.wait [#allocation4], 512  }
 0x328   :  { %361 = vsyncadd [#allocation4], 4294966784 }
 0x329   :  { %280 = vsyncpa [#allocation3], 1 }
 0x32a   :  { %281 = vsyncpa [#allocation4], 1 }

</bundles_post_ra>
